<compile_context>
chip_gen: v6e
topology: v6e:2x2x1
jax: 0.10.0
libtpu: 0.0.40
codegen_flags: <defaults>
</compile_context>

<pallas_src>
import functools

import jax
import jax.numpy as jnp
from jax.experimental import pallas as pl
from jax.experimental.pallas import tpu as pltpu

_LANE = 128
_SUBLANE = 8


def _round_up(x, m):
    return ((x + m - 1) // m) * m


@functools.lru_cache(maxsize=None)
def _vmem_caps():
    """(tile-sizing budget, scoped vmem_limit_bytes), generation-aware."""
    try:
        cap = int(pltpu.get_tpu_info().vmem_capacity_bytes)
    except Exception:
        cap = 64 * 1024 * 1024  # most conservative: v7x per-TensorCore VMEM
    limit = (3 * cap) // 4                  # scoped VMEM requested from Mosaic
    budget = limit - 8 * 1024 * 1024        # headroom for Mosaic internal scratch
    return budget, limit


def _onehot_dict_kernel(x_ref, dict_ref, o_ref):
    # x_ref:    (TR, V) tile of flattened activations
    # dict_ref: (V, E)  full embedding table, single resident VMEM copy
    # o_ref:    (TR, E) tile of output embeddings
    x = x_ref[...]
    v = x.shape[-1]
    # First-max argmax (matches torch.argmax tie-breaking); keepdims keeps 2-D.
    tokens = jnp.argmax(x, axis=-1, keepdims=True)            # (TR, 1) int32
    # (1, V) lane iota broadcast against (TR, 1) tokens: no (TR, V) iota slab.
    lane_ids = jax.lax.broadcasted_iota(jnp.int32, (1, v), 1)
    onehot = (lane_ids == tokens).astype(dict_ref.dtype)      # exact one-hot
    # Gather via MXU: each one-hot row picks exactly one dictionary row.
    # (Bit-exact for finite dictionary entries; nn.Embedding weights are finite.)
    emb = jnp.dot(onehot, dict_ref[...], preferred_element_type=jnp.float32)
    o_ref[...] = emb.astype(o_ref.dtype)


def _pick_row_tile(rows, V, E, x_bytes, d_bytes, requested, budget):
    """Largest sublane-aligned row tile that fits the per-core VMEM budget."""
    vp = _round_up(V, _LANE)   # lane-padded layout footprint of one V-wide row
    ep = _round_up(E, _LANE)
    dict_bytes = _round_up(V, _SUBLANE) * ep * d_bytes  # resident dictionary copy
    if dict_bytes > budget - 4 * 1024 * 1024:
        # TODO(synk): two-phase path (argmax -> int32 tokens, then DMA row-gather
        # over the HBM-resident dictionary) for tables that do not fit VMEM.
        raise ValueError(
            f"dictionary ({dict_bytes / 2**20:.1f} MiB) does not fit the per-core "
            f"VMEM budget ({budget / 2**20:.1f} MiB); two-phase gather not implemented"
        )
    per_row = (
        2 * vp * x_bytes            # double-buffered x tile
        + 2 * ep * d_bytes          # double-buffered output tile
        + vp * (d_bytes + 4)        # one-hot slab (+ compare/bool slack)
        + ep * 4                    # f32 matmul accumulator
    )
    avail = budget - dict_bytes
    max_rows = max((avail // per_row) // _SUBLANE * _SUBLANE, _SUBLANE)
    tile = min(requested, max_rows)
    if tile >= _LANE:
        tile = (tile // _LANE) * _LANE   # keep MXU-friendly 128-multiples
    if rows <= tile:
        return rows                      # single block == full array dim (legal)
    return max(tile, _SUBLANE)


@functools.partial(jax.jit, static_argnames=("row_tile", "vmem_limit"))
def _one_hot_dictionary_impl(x, dictionary, *, row_tile, vmem_limit):
    B, N, V = x.shape
    _, E = dictionary.shape
    rows = B * N
    x2 = x.reshape(rows, V)   # contiguous reshape: no HBM pass

    cost = pl.CostEstimate(
        flops=2 * rows * V * E,
        transcendentals=0,
        bytes_accessed=(
            rows * V * x.dtype.itemsize
            + V * E * dictionary.dtype.itemsize
            + rows * E * dictionary.dtype.itemsize
        ),
    )

    out = pl.pallas_call(
        _onehot_dict_kernel,
        out_shape=jax.ShapeDtypeStruct((rows, E), dictionary.dtype),
        grid_spec=pltpu.PrefetchScalarGridSpec(
            num_scalar_prefetch=0,
            grid=(pl.cdiv(rows, row_tile),),
            in_specs=[
                # Streamed activation tiles (auto double-buffered); boundary
                # blocks are handled by the pipeline, no wrapper padding.
                pl.BlockSpec((row_tile, V), lambda i: (i, 0)),
                # Whole dictionary resident in VMEM: single copy, no
                # double-buffering across grid steps.
                pl.BlockSpec(memory_space=pltpu.MemorySpace.VMEM),
            ],
            out_specs=pl.BlockSpec((row_tile, E), lambda i: (i, 0)),
        ),
        compiler_params=pltpu.CompilerParams(
            dimension_semantics=("parallel",),
            vmem_limit_bytes=vmem_limit,
        ),
        cost_estimate=cost,
    )(x2, dictionary)

    return out.reshape(B, N, E)


def one_hot_dictionary(x, dictionary, *, row_tile=512):
    """x: (B, N, V) float, dictionary: (V, E) float -> (B, N, E)."""
    B, N, V = x.shape
    V2, E = dictionary.shape
    assert V == V2, "vocab mismatch between activations and dictionary"

    budget, limit = _vmem_caps()
    tr = _pick_row_tile(
        B * N, V, E, x.dtype.itemsize, dictionary.dtype.itemsize, row_tile, budget
    )
    return _one_hot_dictionary_impl(x, dictionary, row_tile=tr, vmem_limit=limit)


if __name__ == "__main__":
    # Small shapes consistent with forward: B=2, N=8 tokens, vocab=32, emb=32.
    B, N, VOCAB, EMB = 2, 8, 32, 32

    key = jax.random.PRNGKey(0)
    kx, kd = jax.random.split(key)

    x = jax.random.normal(kx, (B, N, VOCAB), dtype=jnp.float32)
    # Deterministic nn.Embedding-like init (N(0, 1)).
    dictionary = jax.random.normal(kd, (VOCAB, EMB), dtype=jnp.float32)

    out = one_hot_dictionary(x, dictionary)
    out = jax.block_until_ready(out)

    # Reference check in plain JAX (argmax + gather).
    tokens_ref = jnp.argmax(x, axis=-1)
    ref = dictionary[tokens_ref]
    assert out.shape == (B, N, EMB)
    assert jnp.allclose(out, ref), "mismatch vs reference gather"

    print("KERNEL_OK")
</pallas_src>

<mosaic_0001>
module attributes {stable_mosaic.version = 11 : i64} {
  func.func @_onehot_dict_kernel(%arg0: i32, %arg1: memref<16x32xf32, #tpu.memory_space<vmem>>, %arg2: memref<32x32xf32, #tpu.memory_space<vmem>>, %arg3: memref<16x32xf32, #tpu.memory_space<vmem>>) attributes {dimension_semantics = [#tpu.dimension_semantics<parallel>], iteration_bounds = array<i64: 1>, scalar_prefetch = 0 : i64, scratch_operands = 0 : i64, tpu.core_type = #tpu.core_type<tc>, window_params = [{transform_indices = @transform_0, window_bounds = array<i64: 16, 32>}, {pipeline_mode = #tpu.pipeline_mode<synchronous>, transform_indices = @transform_1, window_bounds = array<i64: 32, 32>}, {transform_indices = @transform_2, window_bounds = array<i64: 16, 32>}]} {
    %c0 = arith.constant 0 : index
    %c0_0 = arith.constant 0 : index
    %0 = vector.load %arg1[%c0, %c0_0] : memref<16x32xf32, #tpu.memory_space<vmem>>, vector<16x32xf32>
    %1 = tpu.reduce_index %0 {axis = 1 : i32, kind = #tpu.reduction_kind<arg_max>} : vector<16x32xf32> -> vector<16xi32>
    %2 = vector.shape_cast %1 : vector<16xi32> to vector<16x1xi32>
    %3 = tpu.iota {dimensions = array<i32: 1>} : vector<1x32xi32>
    %4 = vector.broadcast %3 : vector<1x32xi32> to vector<16x32xi32>
    %5 = vector.broadcast %2 : vector<16x1xi32> to vector<16x32xi32>
    %6 = arith.cmpi eq, %4, %5 : vector<16x32xi32>
    %7 = arith.extui %6 : vector<16x32xi1> to vector<16x32xi32>
    %8 = arith.sitofp %7 : vector<16x32xi32> to vector<16x32xf32>
    %c0_1 = arith.constant 0 : index
    %c0_2 = arith.constant 0 : index
    %9 = vector.load %arg2[%c0_1, %c0_2] : memref<32x32xf32, #tpu.memory_space<vmem>>, vector<32x32xf32>
    %cst = arith.constant dense<0.000000e+00> : vector<16x32xf32>
    %10 = tpu.matmul %8, %9, %cst {dimension_numbers = #tpu.dot_dimension_numbers<[1], [0], [0], [1], [0, 0, 1, 1], [], []>} : vector<16x32xf32>, vector<32x32xf32>, vector<16x32xf32> -> vector<16x32xf32>
    %c0_3 = arith.constant 0 : index
    %c0_4 = arith.constant 0 : index
    %11 = vector.load %arg3[%c0_3, %c0_4] : memref<16x32xf32, #tpu.memory_space<vmem>>, vector<16x32xf32>
    tpu.vector_store %arg3[%c0_3, %c0_4], %10 {strides = array<i32>} : memref<16x32xf32, #tpu.memory_space<vmem>>, vector<16x32xf32>,
    return
  }
  func.func @transform_0(%arg0: i32) -> (i32, i32) {
    %c0_i32 = arith.constant 0 : i32
    %c0_i32_0 = arith.constant 0 : i32
    return %arg0, %c0_i32 : i32, i32
  }
  func.func @transform_1(%arg0: i32) -> (i32, i32) {
    %c0_i32 = arith.constant 0 : i32
    %c0_i32_0 = arith.constant 0 : i32
    %c0_i32_1 = arith.constant 0 : i32
    return %c0_i32, %c0_i32_0 : i32, i32
  }
  func.func @transform_2(%arg0: i32) -> (i32, i32) {
    %c0_i32 = arith.constant 0 : i32
    %c0_i32_0 = arith.constant 0 : i32
    return %arg0, %c0_i32 : i32, i32
  }
}

</mosaic_0001>

<bundles_post_ra>
// kernel: _one_hot_dictionary_impl.1
= control target key start
LH: loop header
LB: loop body
LE: loop exit
PB: predicated region body
PF: predicated region fallthrough
CT: control target
= control target key end

     0   :  { %7 = vsyncpa [#allocation3], 0  ;;  %s300_s0 = inlined_call_operand.hbm [shape: f32[16,32], index: 0, kind: input, shape index: {}]   ;;  %s301_s1 = inlined_call_operand.hbm [shape: f32[32,32], index: 1, kind: input, shape index: {}]   ;;  %s302_s2 = inlined_call_operand.hbm [shape: f32[16,32], index: 2, kind: output, shape index: {}]  }
   0x1   :  { %8 = vsyncpa [#allocation6], 0 }
   0x2   :  { %9 = vsyncpa [#allocation4], 0  ;;  %s255_s9 = smov [#allocation2]  }
   0x3   :  { %s15_s10 = sshll.u32 %s255_s9, 4  ;;  %s16_s10 = int_to_ptr.vmem [resolvable:$true] %s15_s10 }
   0x4   :  { %s197_s11 = scalar_lea.vmem %s16_s10, 256  ;;  %p202_p1 = scmp.lt.s32.totalorder %s16_s10, %s16_s10 }
   0x5   :  { %p198_p0 = scmp.ne.s32.totalorder %s16_s10, %s197_s11  ;;  %p203_p2 = scmp.lt.s32.totalorder %s197_s11, %s197_s11 }
   0x7   :  { %p204_p3 = por %p203_p2, %p202_p1 }
   0x9   :  { %p205_p4 = pnand %p204_p3, %p198_p0 }
   0xb   :  { %208 = shalt.err (!%p205_p4)
}
   0xc   :  { %s256_s12 = smov 128   ;;  %s257_s13 = smov 8  }
   0xd   :  { %21 = dma.hbm_to_vmem [thread:$0]  %s300_s0, 256, %s16_s10, [#allocation3], %s256_s12, %s256_s12, %s257_s13  }
   0xe   :  { %s258_s16 = smov [#allocation5]  }
   0xf   :  { %s27_s17 = sshll.u32 %s258_s16, 4  ;;  %s28_s17 = int_to_ptr.vmem [resolvable:$true] %s27_s17 }
  0x10   :  { %s217_s18 = scalar_lea.vmem %s28_s17, 512  ;;  %p222_p6 = scmp.lt.s32.totalorder %s28_s17, %s28_s17 }
  0x11   :  { %p218_p5 = scmp.ne.s32.totalorder %s28_s17, %s217_s18  ;;  %p223_p7 = scmp.lt.s32.totalorder %s217_s18, %s217_s18 }
  0x13   :  { %p224_p8 = por %p223_p7, %p222_p6 }
  0x15   :  { %p225_p9 = pnand %p224_p8, %p218_p5 }
  0x17   :  { %228 = shalt.err (!%p225_p9)
}
  0x18   :  { %33 = dma.hbm_to_vmem [thread:$0]  %s301_s1, 512, %s28_s17, [#allocation6], %s256_s12, %s256_s12, %s257_s13  }
  0x19   :  { %249 = dma.done.wait [#allocation3], 256  }
  0x1a   :  { %250 = vsyncadd [#allocation3], 4294967040 }
  0x1b   :  { %251 = dma.done.wait [#allocation6], 512  }
  0x1c   :  { %252 = vsyncadd [#allocation6], 4294966784  ;;  %vm42_vm0 = vcmask 261120   ;;  %v40_v0 = vld [vmem:[#allocation2] sm:$0xff]  ;;  %v41_v1 = vld [vmem:[#allocation2 + $0x8] sm:$0xff]  ;;  %v49_v8 = vlaneseq  ;;  %v259_v11 = vmov 0.0  }
  0x1d   :  { %v60_v2 = vld [vmem:[#allocation5 + $0x18] sm:$0xff]  ;;  %v43_v3 = vsel %vm42_vm0, %v40_v0, -inf  ;;  %v46_v4 = vsel %vm42_vm0, %v41_v1, -inf  ;;  %v59_v5 = vld [vmem:[#allocation5 + $0x10] sm:$0xff]  ;;  %v58_v6 = vld [vmem:[#allocation5 + $0x8] sm:$0xff]  ;;  %s260_s0 = smov [#allocation7]  }
  0x1e   :  { %172 = vmatprep.subr.mxu0 %v60_v2  ;;  %44 = vmax.index.xlane.f32.xlu0 %v43_v3  ;;  %v57_v7 = vld [vmem:[#allocation5] sm:$0xff]  ;;  %v50_v9 = vand.u32 127, %v49_v8  ;;  %s149_s1 = sshll.u32 %s260_s0, 4  ;;  %s150_s1 = int_to_ptr.vmem [resolvable:$true] %s149_s1 }
  0x1f   :  { %173 = vmatpush3.msra.mxu0 %v60_v2  ;;  %s229_s21 = scalar_lea.vmem %s150_s1, 256  ;;  %p234_p11 = scmp.lt.s32.totalorder %s150_s1, %s150_s1 }
  0x20   :  { %174 = vmatprep.subr.mxu0 %v59_v5  ;;  %p230_p10 = scmp.ne.s32.totalorder %s150_s1, %s229_s21  ;;  %p235_p12 = scmp.lt.s32.totalorder %s229_s21, %s229_s21 }
  0x21   :  { %175 = vmatpush3.msra.mxu0 %v59_v5 }
  0x22   :  { %47 = vmax.index.xlane.f32.xlu0 %v46_v4  ;;  %176 = vmatprep.subr.mxu0 %v58_v6  ;;  %p236_p13 = por %p235_p12, %p234_p11 }
  0x23   :  { %177 = vmatpush3.msra.mxu0 %v58_v6 }
  0x24   :  { %178 = vmatprep.subr.mxu0 %v57_v7  ;;  %p237_p0 = pnand %p236_p13, %p230_p10 }
  0x25   :  { %179 = vmatpush3.msra.mxu0 %v57_v7 }
  0xa7   :  { %v45_v10 = vpop.xlane.xlu0 %44 }
  0xa8   :  { %vm51_vm1 = vcmp.eq.s32.totalorder %v50_v9, %v45_v10 }
  0xa9   :  { %v162_v12 = vsel %vm51_vm1, 1.0, %v259_v11 }
  0xaa   :  { %180 = vmatprep.mubr.msk.f32.mxu0 %vm42_vm0, %v162_v12 }
  0xab   :  { %v48_v13 = vpop.xlane.xlu0 %47 }
  0xac   :  { %vm52_vm2 = vcmp.eq.s32.totalorder %v50_v9, %v48_v13 }
  0xad   :  { %v163_v14 = vsel %vm52_vm2, 1.0, %v259_v11 }
  0xae   :  { %181 = vmatmul.mubr.msk.f32.vlgmr.msra.gmra.mxu0 %vm42_vm0, %v163_v14 }
 0x16e   :  { %v182_v15 = vpop.f32.mrf.mxu0 }
 0x16f   :  { %143 = vst.msk [vmem:[#allocation7 + $0x8] sm:$0xff] %vm42_vm0, %v182_v15 }
 0x170   :  { %v133_v16 = vpop.f32.mrf.mxu0 }
 0x171   :  { %142 = vst.msk [vmem:[#allocation7] sm:$0xff] %vm42_vm0, %v133_v16 }
 0x172   :  { %240 = shalt.err (!%p237_p0)
}
 0x173   :  { %155 = dma.vmem_to_hbm [thread:$0]  %s150_s1, 256, %s302_s2, [#allocation4], %s256_s12, %s256_s12, %s257_s13  }
 0x174   :  { %253 = dma.done.wait [#allocation4], 256  }
 0x175   :  { %254 = vsyncadd [#allocation4], 4294967040 }
 0x176   :  { %159 = vsyncpa [#allocation3], 1 }
 0x177   :  { %160 = vsyncpa [#allocation6], 1 }
 0x178   :  { %161 = vsyncpa [#allocation4], 1 }

</bundles_post_ra>
